<compile_context>
chip_gen: v7x
topology: tpu7x:2x2x1
jax: 0.10.0
libtpu: 0.0.40
codegen_flags: <defaults>
</compile_context>

<pallas_src>
import jax
import jax.numpy as jnp
from jax.experimental import pallas as pl
from jax.experimental.pallas import tpu as pltpu


def _round_up(x, m):
    return (x + m - 1) // m * m


def matmul_kernel(lhs_ref, rhs_ref, o_ref):
    # lhs_ref: (M_BLK, Kp)   rhs_ref: (Kp, Coutp)   o_ref: (M_BLK, Coutp)
    o_ref[...] = jnp.dot(
        lhs_ref[...], rhs_ref[...], preferred_element_type=jnp.float32
    ).astype(o_ref.dtype)


def conv2d_pallas(x_nchw, w_oihw, *, num_m_blocks=2):
    """Valid (padding=0) stride-1 conv, bias-free. x: (N,Cin,H,W), w: (O,Cin,KH,KW)."""
    N, Cin, H, W = x_nchw.shape
    O, _, KH, KW = w_oihw.shape
    Ho, Wo = H - KH + 1, W - KW + 1
    K = KH * KW * Cin
    M = N * Ho * Wo

    # ---- im2col in the wrapper (pure data movement; the matmul runs in Pallas) ----
    x_nhwc = jnp.transpose(x_nchw, (0, 2, 3, 1))                 # (N, H, W, Cin)
    taps = []
    for kh in range(KH):
        for kw in range(KW):
            taps.append(x_nhwc[:, kh:kh + Ho, kw:kw + Wo, :])    # (N, Ho, Wo, Cin)
    patches = jnp.concatenate(taps, axis=-1)                     # (N, Ho, Wo, KH*KW*Cin)
    lhs = patches.reshape(M, K)                                  # (M, K), (kh,kw,c) order

    # Weight as one 2-D (K, O) matrix matching the patch layout: OIHW -> HWIO -> (K, O).
    rhs = jnp.transpose(w_oihw, (2, 3, 1, 0)).reshape(K, O)

    # ---- pad to TPU-friendly shapes: lane-dense Cout (128), 8-aligned K and M blocks ----
    Kp = _round_up(K, 8)                         # 36 -> 40
    Op = _round_up(O, 128)                       # 20 -> 128 (lane-dense output)
    M_blk = _round_up(pl.cdiv(M, num_m_blocks), 8)
    Mp = num_m_blocks * M_blk                    # 392 -> 400 (2 blocks of 200)

    lhs_p = jnp.zeros((Mp, Kp), lhs.dtype).at[:M, :K].set(lhs)
    rhs_p = jnp.zeros((Kp, Op), rhs.dtype).at[:K, :O].set(rhs)

    cost = pl.CostEstimate(
        flops=2 * N * Ho * Wo * KH * KW * Cin * O,
        transcendentals=0,
        bytes_accessed=(lhs_p.size + rhs_p.size + Mp * Op) * 4,
    )

    out_p = pl.pallas_call(
        matmul_kernel,
        out_shape=jax.ShapeDtypeStruct((Mp, Op), x_nchw.dtype),
        grid_spec=pltpu.PrefetchScalarGridSpec(
            num_scalar_prefetch=0,
            grid=(num_m_blocks,),                # size-2 parallel axis: both v7x TCs busy
            in_specs=[
                pl.BlockSpec((M_blk, Kp), lambda i: (i, 0)),
                pl.BlockSpec((Kp, Op), lambda i: (0, 0)),   # weight tile reused by every block
            ],
            out_specs=pl.BlockSpec((M_blk, Op), lambda i: (i, 0)),
        ),
        compiler_params=pltpu.CompilerParams(
            dimension_semantics=("parallel",),
        ),
        cost_estimate=cost,
    )(lhs_p, rhs_p)

    out = out_p[:M, :O].reshape(N, Ho, Wo, O)
    return jnp.transpose(out, (0, 3, 1, 2))                      # back to NCHW


if __name__ == "__main__":
    key = jax.random.PRNGKey(0)
    kx, kw = jax.random.split(key)

    # Matches Net_v1: Conv2d(in=4, out=20, k=3, stride=1, bias=False)
    x = jax.random.normal(kx, (2, 4, 16, 16), dtype=jnp.float32)       # NCHW
    w = jax.random.normal(kw, (20, 4, 3, 3), dtype=jnp.float32) * 0.1  # OIHW

    out = conv2d_pallas(x, w)
    out = jax.block_until_ready(out)

    # Sanity check against XLA's reference convolution.
    ref = jax.lax.conv_general_dilated(
        x, w, window_strides=(1, 1), padding="VALID",
        dimension_numbers=("NCHW", "OIHW", "NCHW"))
    assert out.shape == (2, 20, 14, 14), out.shape
    assert jnp.allclose(out, ref, atol=1e-4, rtol=1e-4)

    print("KERNEL_OK")
</pallas_src>

<mosaic_0001>
module attributes {stable_mosaic.version = 11 : i64} {
  func.func @matmul_kernel(%arg0: i32, %arg1: memref<200x40xf32, #tpu.memory_space<vmem>>, %arg2: memref<40x128xf32, #tpu.memory_space<vmem>>, %arg3: memref<200x128xf32, #tpu.memory_space<vmem>>) attributes {dimension_semantics = [#tpu.dimension_semantics<parallel>], iteration_bounds = array<i64: 2>, scalar_prefetch = 0 : i64, scratch_operands = 0 : i64, tpu.core_type = #tpu.core_type<tc>, window_params = [{transform_indices = @transform_0, window_bounds = array<i64: 200, 40>}, {pipeline_mode = #tpu.pipeline_mode<synchronous>, transform_indices = @transform_1, window_bounds = array<i64: 40, 128>}, {transform_indices = @transform_2, window_bounds = array<i64: 200, 128>}]} {
    %c0 = arith.constant 0 : index
    %c0_0 = arith.constant 0 : index
    %0 = vector.load %arg1[%c0, %c0_0] : memref<200x40xf32, #tpu.memory_space<vmem>>, vector<200x40xf32>
    %c0_1 = arith.constant 0 : index
    %c0_2 = arith.constant 0 : index
    %1 = vector.load %arg2[%c0_1, %c0_2] : memref<40x128xf32, #tpu.memory_space<vmem>>, vector<40x128xf32>
    %cst = arith.constant dense<0.000000e+00> : vector<200x128xf32>
    %2 = tpu.matmul %0, %1, %cst {dimension_numbers = #tpu.dot_dimension_numbers<[1], [0], [0], [1], [0, 0, 1, 1], [], []>} : vector<200x40xf32>, vector<40x128xf32>, vector<200x128xf32> -> vector<200x128xf32>
    %c0_3 = arith.constant 0 : index
    %c0_4 = arith.constant 0 : index
    %3 = vector.load %arg3[%c0_3, %c0_4] : memref<200x128xf32, #tpu.memory_space<vmem>>, vector<200x128xf32>
    tpu.vector_store %arg3[%c0_3, %c0_4], %2 {strides = array<i32>} : memref<200x128xf32, #tpu.memory_space<vmem>>, vector<200x128xf32>,
    return
  }
  func.func @transform_0(%arg0: i32) -> (i32, i32) {
    %c0_i32 = arith.constant 0 : i32
    %c0_i32_0 = arith.constant 0 : i32
    return %arg0, %c0_i32 : i32, i32
  }
  func.func @transform_1(%arg0: i32) -> (i32, i32) {
    %c0_i32 = arith.constant 0 : i32
    %c0_i32_0 = arith.constant 0 : i32
    %c0_i32_1 = arith.constant 0 : i32
    return %c0_i32, %c0_i32_0 : i32, i32
  }
  func.func @transform_2(%arg0: i32) -> (i32, i32) {
    %c0_i32 = arith.constant 0 : i32
    %c0_i32_0 = arith.constant 0 : i32
    return %arg0, %c0_i32 : i32, i32
  }
}

</mosaic_0001>

<bundles_post_ra>
// kernel: tpu_custom_call.1
= control target key start
LH: loop header
LB: loop body
LE: loop exit
PB: predicated region body
PF: predicated region fallthrough
CT: control target
= control target key end

     0   :  { %7 = vsyncpa [#allocation3], 0  ;;  %s1086_s0 = inlined_call_operand.vmem [shape: f32[400,40], index: 0, kind: input, shape index: {}]   ;;  %s1087_s1 = inlined_call_operand.vmem [shape: f32[40,128], index: 1, kind: input, shape index: {}]   ;;  %s1088_s2 = inlined_call_operand.hbm [shape: f32[400,128], index: 2, kind: output, shape index: {}]  }
   0x1   :  { %9 = vsyncpa [#allocation3 + $0x1], 0  ;;  %s833_s9 = smov 0   ;;  %s835_s10 = smov 0  }
   0x2   :  { %s837_s11 = smov 0   ;;  %s839_s12 = smov 0  }
   0x3 LB: > { %s854_s13 = sadd.s32 4294967295, %s810_s12   ;;  %s542_s14 = sadd.s32 4294967294, %s810_s12   ;;  %s810_s12 = sphi %s839_s12, %s1094_s12   ;;  %s806_s11 = sphi %s837_s11, %s1093_s11   ;;  %s802_s10 = sphi %s835_s10, %s1092_s10   ;;  %s798_s9 = sphi %s833_s9, %s1091_s9  }
   0x4   : > { %s858_s15 = sadd.s32 1, %s810_s12   ;;  %s69_s16 = sadd.s32 1, %s806_s11 }
   0x5   : > { %s66_s17 = ssub.s32 %s810_s12, %s858_s15  ;;  %p79_p0 = scmp.ne.s32.totalorder %s806_s11, %s802_s10 }
   0x6   : > { %p67_p1 = scmp.eq.s32.totalorder %s66_s17, 0  ;;  %p80_p2 = scmp.eq.s32.totalorder %s854_s13, 1 }
   0x7   : > { %p85_p3 = scmp.ne.s32.totalorder %s802_s10, %s798_s9  ;;  %p86_p4 = scmp.eq.s32.totalorder %s542_s14, 1 }
   0x8   : > { %s869_s18 = scalar_select %p67_p1, %s806_s11, %s69_s16  }
   0x9   : > { %p871_p5 = por %p80_p2, %p79_p0  ;;  %p875_p6 = por %p86_p4, %p85_p3 }
   0xa   : > { %p545_p7 = scmp.ge.s32.totalorder %s810_s12, 1  ;;  %p116_p8 = scmp.lt.s32.totalorder %s810_s12, 3 }
   0xc   : > { %p117_p9 = pnand %p545_p7, %p116_p8 }
   0xd   : > { %v170_v0 = vld [vmem:[%s1087_s1] sm:$0xff] (!%p117_p9)  ;;  %v171_v1 = vld [vmem:[%s1087_s1 + $0x8] sm:$0xff] (!%p117_p9)  ;;  %v172_v2 = vld [vmem:[%s1087_s1 + $0x10] sm:$0xff] (!%p117_p9)  ;;  %v812_v3 = vmov (!%p117_p9), 0.0|0.0   ;;  %s138_s29 = smul.u32 (!%p117_p9), 25, %s854_s13  ;;  %vm813_vm0 = vmmov (!%p117_p9), 0  }
   0xe   : > { %120 = sbr.rel (%p117_p9) target bundleno = 300 (0x12c), region = 28  ;;  %691 = vmatprep.subr.bf16.mxu0 (!%p117_p9), %v812_v3  ;;  %v692_v4 = vpack.c.bf16 (!%p117_p9), %v171_v1, %v170_v0  ;;  %697 = vmatprep.subr.bf16.mxu1 (!%p117_p9), %v812_v3  ;;  %v173_v5 = vld [vmem:[%s1087_s1 + $0x18] sm:$0xff] (!%p117_p9)  ;;  %v814_v6 = vmov (!%p117_p9), 0.0   ;;  %v174_v8 = vld [vmem:[%s1087_s1 + $0x20] sm:$0xff] (!%p117_p9)  ;;  %vm175_vm1 = vcmask (!%p117_p9), 326656   ;;  %s135_s8 = sand.u32 (!%p117_p9), 1, %s802_s10  }
   0xf   : > { %616 = vmatprep.mubr.msk.f32.mxu0 (!%p117_p9), %vm813_vm0, %v814_v6  ;;  %655 = vmatprep.mubr.msk.f32.mxu1 (!%p117_p9), %vm813_vm0, %v814_v6  ;;  %v695_v7 = vpack.c.bf16 (!%p117_p9), %v173_v5, %v172_v2  ;;  %p139_p10 = scmp.lt.s32.totalorder (!%p117_p9), %s138_s29, 49  ;;  %s703_s14 = smul.u32 (!%p117_p9), 200, %s135_s8 }
  0x10   : > { %693 = vmatpush3.bf16.msra.mxu0 (!%p117_p9), %v692_v4  ;;  %700 = vmatpush3.bf16.msra.mxu1 (!%p117_p9), %v692_v4  ;;  %s575_s17 = smul.u32 (!%p117_p9), 3200, %s854_s13  ;;  %s1045_s13 = scalar_lea.sflag (!%p117_p9), [#allocation3], %s135_s8 }
  0x11   : > { %694 = vmatprep.subr.bf16.mxu0 (!%p117_p9), %v812_v3  ;;  %698 = vmatprep.subr.bf16.mxu1 (!%p117_p9), %v812_v3  ;;  %s1007_s16 = scalar_lea.vmem (!%p117_p9), [#allocation2], %s703_s14  ;;  %s815_s26 = smov (!%p117_p9), [#allocation2]  }
  0x12   : > { %s480_s21 = sshll.u32 (!%p117_p9), %s1007_s16, 4  ;;  %s1038_s24 = scalar_lea.hbm (!%p117_p9), %s1088_s2, %s575_s17  ;;  %s1040_s21 = int_to_ptr.vmem [resolvable:$true] %s480_s21 }
  0x13   : > { %s748_s25 = scalar_lea.vmem (!%p117_p9), %s1040_s21, 3200  ;;  %s752_s27 = sshll.u32 (!%p117_p9), %s815_s26, 4  ;;  %s753_s27 = int_to_ptr.vmem [resolvable:$false] %s752_s27 }
  0x14   : > { %696 = vmatpush3.bf16.msra.mxu0 (!%p117_p9), %v695_v7  ;;  %701 = vmatpush3.bf16.msra.mxu1 (!%p117_p9), %v695_v7  ;;  %p749_p11 = scmp.ne.s32.totalorder (!%p117_p9), %s1040_s21, %s748_s25  ;;  %s754_s28 = scalar_lea.vmem (!%p117_p9), %s753_s27, 6400 }
  0x15   : > { %s1096_s29 = smov (!%p139_p10, %s138_s29), 49  ;;  %614 = vmatprep.subr.mxu0 %v814_v6  ;;  %699 = vmatprep.subr.mxu1 %v814_v6  ;;  %p755_p0 = scmp.lt.s32.totalorder %s1040_s21, %s753_s27 }
  0x16   : > { %s546_s30 = sshll.u32 %s1096_s29, 3  ;;  %p750_p12 = pnand %p749_p11, %p871_p5 }
  0x17   : > { %s905_s7 = scalar_lea.vmem %s1086_s0, %s546_s30  ;;  %p756_p1 = scmp.lt.s32.totalorder %s754_s28, %s748_s25 }
  0x18   : > { %v145_v9 = vld [vmem:[%s905_s7] sm:$0xff]  ;;  %v158_v10 = vld [vmem:[%s905_s7 + $0x68] sm:$0xff]  ;;  %615 = vmatpush3.msra.mxu0 %v174_v8  ;;  %702 = vmatpush3.msra.mxu1 %v174_v8  ;;  %v159_v12 = vld [vmem:[%s905_s7 + $0x70] sm:$0xff]  ;;  %p751_p13 = pneg %p750_p12 }
  0x19   : > { %617 = vmatmul.mubr.msk.f32.vlgmr.msra.gmra.mrb[0].mxu0 %vm175_vm1, %v145_v9  ;;  %656 = vmatmul.mubr.msk.f32.vlgmr.msra.gmra.mrb[0].mxu1 %vm175_vm1, %v158_v10  ;;  %v146_v11 = vld [vmem:[%s905_s7 + $0x8] sm:$0xff]  ;;  %v147_v13 = vld [vmem:[%s905_s7 + $0x10] sm:$0xff]  ;;  %v160_v14 = vld [vmem:[%s905_s7 + $0x78] sm:$0xff]  ;;  %p757_p2 = por %p756_p1, %p755_p0 }
  0x1a   : > { %619 = vmatprep.mubr.msk.f32.mxu0 %vm813_vm0, %v814_v6  ;;  %658 = vmatprep.mubr.msk.f32.mxu1 %vm813_vm0, %v814_v6  ;;  %v148_v15 = vld [vmem:[%s905_s7 + $0x18] sm:$0xff]  ;;  %v161_v16 = vld [vmem:[%s905_s7 + $0x80] sm:$0xff]  ;;  %v162_v18 = vld [vmem:[%s905_s7 + $0x88] sm:$0xff] }
  0x1b   : > { %v149_v17 = vld [vmem:[%s905_s7 + $0x20] sm:$0xff]  ;;  %v150_v19 = vld [vmem:[%s905_s7 + $0x28] sm:$0xff]  ;;  %v163_v20 = vld [vmem:[%s905_s7 + $0x90] sm:$0xff]  ;;  %p758_p3 = pnand %p757_p2, %p751_p13 }
  0x1c   : > { %v151_v21 = vld [vmem:[%s905_s7 + $0x30] sm:$0xff]  ;;  %v164_v22 = vld [vmem:[%s905_s7 + $0x98] sm:$0xff]  ;;  %v165_v24 = vld [vmem:[%s905_s7 + $0xa0] sm:$0xff] }
  0x1d   : > { %620 = vmatmul.mubr.msk.f32.gmra.mrb[2].mxu0 %vm175_vm1, %v146_v11  ;;  %659 = vmatmul.mubr.msk.f32.gmra.mrb[2].mxu1 %vm175_vm1, %v159_v12  ;;  %v152_v23 = vld [vmem:[%s905_s7 + $0x38] sm:$0xff]  ;;  %v153_v25 = vld [vmem:[%s905_s7 + $0x40] sm:$0xff]  ;;  %v166_v26 = vld [vmem:[%s905_s7 + $0xa8] sm:$0xff] }
  0x1e   : > { %622 = vmatprep.mubr.msk.f32.mxu0 %vm813_vm0, %v814_v6  ;;  %661 = vmatprep.mubr.msk.f32.mxu1 %vm813_vm0, %v814_v6  ;;  %v154_v27 = vld [vmem:[%s905_s7 + $0x48] sm:$0xff]  ;;  %v167_v28 = vld [vmem:[%s905_s7 + $0xb0] sm:$0xff]  ;;  %v168_v30 = vld [vmem:[%s905_s7 + $0xb8] sm:$0xff] }
  0x1f   : > { %v155_v29 = vld [vmem:[%s905_s7 + $0x50] sm:$0xff]  ;;  %v156_v31 = vld [vmem:[%s905_s7 + $0x58] sm:$0xff]  ;;  %v169_v32 = vld [vmem:[%s905_s7 + $0xc0] sm:$0xff] }
  0x20   : > { %v157_v33 = vld [vmem:[%s905_s7 + $0x60] sm:$0xff] }
  0x21   : > { %623 = vmatmul.mubr.msk.f32.gmra.mrb[4].mxu0 %vm175_vm1, %v147_v13  ;;  %662 = vmatmul.mubr.msk.f32.gmra.mrb[4].mxu1 %vm175_vm1, %v160_v14 }
  0x22   : > { %625 = vmatprep.mubr.msk.f32.mxu0 %vm813_vm0, %v814_v6  ;;  %664 = vmatprep.mubr.msk.f32.mxu1 %vm813_vm0, %v814_v6 }
  0x25   : > { %626 = vmatmul.mubr.msk.f32.gmra.mrb[6].mxu0 %vm175_vm1, %v148_v15  ;;  %665 = vmatmul.mubr.msk.f32.gmra.mrb[6].mxu1 %vm175_vm1, %v161_v16 }
  0x26   : > { %628 = vmatprep.mubr.msk.f32.mxu0 %vm813_vm0, %v814_v6  ;;  %667 = vmatprep.mubr.msk.f32.mxu1 %vm813_vm0, %v814_v6 }
  0x29   : > { %629 = vmatmul.mubr.msk.f32.gmra.mrb[8].mxu0 %vm175_vm1, %v149_v17  ;;  %668 = vmatmul.mubr.msk.f32.gmra.mrb[8].mxu1 %vm175_vm1, %v162_v18 }
  0x2a   : > { %631 = vmatprep.mubr.msk.f32.mxu0 %vm813_vm0, %v814_v6  ;;  %670 = vmatprep.mubr.msk.f32.mxu1 %vm813_vm0, %v814_v6 }
  0x2d   : > { %632 = vmatmul.mubr.msk.f32.gmra.mrb[10].mxu0 %vm175_vm1, %v150_v19  ;;  %671 = vmatmul.mubr.msk.f32.gmra.mrb[10].mxu1 %vm175_vm1, %v163_v20 }
  0x2e   : > { %634 = vmatprep.mubr.msk.f32.mxu0 %vm813_vm0, %v814_v6  ;;  %673 = vmatprep.mubr.msk.f32.mxu1 %vm813_vm0, %v814_v6 }
  0x31   : > { %635 = vmatmul.mubr.msk.f32.gmra.mrb[12].mxu0 %vm175_vm1, %v151_v21  ;;  %674 = vmatmul.mubr.msk.f32.gmra.mrb[12].mxu1 %vm175_vm1, %v164_v22 }
  0x32   : > { %637 = vmatprep.mubr.msk.f32.mxu0 %vm813_vm0, %v814_v6  ;;  %676 = vmatprep.mubr.msk.f32.mxu1 %vm813_vm0, %v814_v6 }
  0x35   : > { %638 = vmatmul.mubr.msk.f32.gmra.mrb[14].mxu0 %vm175_vm1, %v152_v23  ;;  %677 = vmatmul.mubr.msk.f32.gmra.mrb[14].mxu1 %vm175_vm1, %v165_v24 }
  0x36   : > { %640 = vmatprep.mubr.msk.f32.mxu0 %vm813_vm0, %v814_v6  ;;  %679 = vmatprep.mubr.msk.f32.mxu1 %vm813_vm0, %v814_v6 }
  0x39   : > { %641 = vmatmul.mubr.msk.f32.gmra.mrb[16].mxu0 %vm175_vm1, %v153_v25  ;;  %680 = vmatmul.mubr.msk.f32.gmra.mrb[16].mxu1 %vm175_vm1, %v166_v26 }
  0x3a   : > { %643 = vmatprep.mubr.msk.f32.mxu0 %vm813_vm0, %v814_v6  ;;  %682 = vmatprep.mubr.msk.f32.mxu1 %vm813_vm0, %v814_v6 }
  0x3d   : > { %644 = vmatmul.mubr.msk.f32.gmra.mrb[18].mxu0 %vm175_vm1, %v154_v27  ;;  %683 = vmatmul.mubr.msk.f32.gmra.mrb[18].mxu1 %vm175_vm1, %v167_v28 }
  0x3e   : > { %646 = vmatprep.mubr.msk.f32.mxu0 %vm813_vm0, %v814_v6  ;;  %685 = vmatprep.mubr.msk.f32.mxu1 %vm813_vm0, %v814_v6 }
  0x41   : > { %647 = vmatmul.mubr.msk.f32.gmra.mrb[20].mxu0 %vm175_vm1, %v155_v29  ;;  %686 = vmatmul.mubr.msk.f32.gmra.mrb[20].mxu1 %vm175_vm1, %v168_v30 }
  0x42   : > { %649 = vmatprep.mubr.msk.f32.mxu0 %vm813_vm0, %v814_v6  ;;  %688 = vmatprep.mubr.msk.f32.mxu1 %vm813_vm0, %v814_v6 }
  0x45   : > { %650 = vmatmul.mubr.msk.f32.gmra.mrb[22].mxu0 %vm175_vm1, %v156_v31  ;;  %689 = vmatmul.mubr.msk.f32.gmra.mrb[22].mxu1 %vm175_vm1, %v169_v32 }
  0x46   : > { %652 = vmatprep.mubr.msk.f32.mxu0 %vm813_vm0, %v814_v6 }
  0x49   : > { %653 = vmatmul.mubr.msk.f32.gmra.mrb[24].mxu0 %vm175_vm1, %v157_v33 }
  0xec   : > { %v317_v34 = vpop.f32.mrb[0].mxu0  ;;  %v382_v35 = vpop.f32.mrb[0].mxu1 }
  0xed   : > { %441 = vst [vmem:[%s1007_s16] sm:$0xff] %v317_v34  ;;  %v618_v36 = vpop.f32.mrb[1].mxu0  ;;  %454 = vst [vmem:[%s1007_s16 + $0x68] sm:$0xff] %v382_v35  ;;  %v657_v37 = vpop.f32.mrb[1].mxu1 }
  0xf0   : > { %v322_v38 = vpop.f32.mrb[2].mxu0  ;;  %v387_v39 = vpop.f32.mrb[2].mxu1 }
  0xf1   : > { %442 = vst [vmem:[%s1007_s16 + $0x8] sm:$0xff] %v322_v38  ;;  %v621_v40 = vpop.f32.mrb[3].mxu0  ;;  %455 = vst [vmem:[%s1007_s16 + $0x70] sm:$0xff] %v387_v39  ;;  %v660_v41 = vpop.f32.mrb[3].mxu1 }
  0xf4   : > { %v327_v42 = vpop.f32.mrb[4].mxu0  ;;  %v392_v43 = vpop.f32.mrb[4].mxu1 }
  0xf5   : > { %443 = vst [vmem:[%s1007_s16 + $0x10] sm:$0xff] %v327_v42  ;;  %v624_v44 = vpop.f32.mrb[5].mxu0  ;;  %456 = vst [vmem:[%s1007_s16 + $0x78] sm:$0xff] %v392_v43  ;;  %v663_v45 = vpop.f32.mrb[5].mxu1 }
  0xf8   : > { %v332_v46 = vpop.f32.mrb[6].mxu0  ;;  %v397_v47 = vpop.f32.mrb[6].mxu1 }
  0xf9   : > { %444 = vst [vmem:[%s1007_s16 + $0x18] sm:$0xff] %v332_v46  ;;  %v627_v48 = vpop.f32.mrb[7].mxu0  ;;  %457 = vst [vmem:[%s1007_s16 + $0x80] sm:$0xff] %v397_v47  ;;  %v666_v49 = vpop.f32.mrb[7].mxu1 }
  0xfc   : > { %v337_v50 = vpop.f32.mrb[8].mxu0  ;;  %v402_v51 = vpop.f32.mrb[8].mxu1 }
  0xfd   : > { %445 = vst [vmem:[%s1007_s16 + $0x20] sm:$0xff] %v337_v50  ;;  %v630_v52 = vpop.f32.mrb[9].mxu0  ;;  %458 = vst [vmem:[%s1007_s16 + $0x88] sm:$0xff] %v402_v51  ;;  %v669_v53 = vpop.f32.mrb[9].mxu1 }
 0x100   : > { %v342_v54 = vpop.f32.mrb[10].mxu0  ;;  %v407_v55 = vpop.f32.mrb[10].mxu1 }
 0x101   : > { %446 = vst [vmem:[%s1007_s16 + $0x28] sm:$0xff] %v342_v54  ;;  %v633_v56 = vpop.f32.mrb[11].mxu0  ;;  %459 = vst [vmem:[%s1007_s16 + $0x90] sm:$0xff] %v407_v55  ;;  %v672_v57 = vpop.f32.mrb[11].mxu1 }
 0x104   : > { %v347_v58 = vpop.f32.mrb[12].mxu0  ;;  %v412_v59 = vpop.f32.mrb[12].mxu1 }
 0x105   : > { %447 = vst [vmem:[%s1007_s16 + $0x30] sm:$0xff] %v347_v58  ;;  %v636_v60 = vpop.f32.mrb[13].mxu0  ;;  %460 = vst [vmem:[%s1007_s16 + $0x98] sm:$0xff] %v412_v59  ;;  %v675_v61 = vpop.f32.mrb[13].mxu1 }
 0x108   : > { %v352_v62 = vpop.f32.mrb[14].mxu0  ;;  %v417_v63 = vpop.f32.mrb[14].mxu1 }
 0x109   : > { %448 = vst [vmem:[%s1007_s16 + $0x38] sm:$0xff] %v352_v62  ;;  %v639_v0 = vpop.f32.mrb[15].mxu0  ;;  %461 = vst [vmem:[%s1007_s16 + $0xa0] sm:$0xff] %v417_v63  ;;  %v678_v1 = vpop.f32.mrb[15].mxu1 }
 0x10c   : > { %v357_v2 = vpop.f32.mrb[16].mxu0  ;;  %v422_v3 = vpop.f32.mrb[16].mxu1 }
 0x10d   : > { %449 = vst [vmem:[%s1007_s16 + $0x40] sm:$0xff] %v357_v2  ;;  %v642_v4 = vpop.f32.mrb[17].mxu0  ;;  %462 = vst [vmem:[%s1007_s16 + $0xa8] sm:$0xff] %v422_v3  ;;  %v681_v5 = vpop.f32.mrb[17].mxu1 }
 0x110   : > { %v362_v6 = vpop.f32.mrb[18].mxu0  ;;  %v427_v7 = vpop.f32.mrb[18].mxu1 }
 0x111   : > { %450 = vst [vmem:[%s1007_s16 + $0x48] sm:$0xff] %v362_v6  ;;  %v645_v8 = vpop.f32.mrb[19].mxu0  ;;  %463 = vst [vmem:[%s1007_s16 + $0xb0] sm:$0xff] %v427_v7  ;;  %v684_v9 = vpop.f32.mrb[19].mxu1 }
 0x114   : > { %v367_v10 = vpop.f32.mrb[20].mxu0  ;;  %v432_v11 = vpop.f32.mrb[20].mxu1 }
 0x115   : > { %451 = vst [vmem:[%s1007_s16 + $0x50] sm:$0xff] %v367_v10  ;;  %v648_v12 = vpop.f32.mrb[21].mxu0  ;;  %464 = vst [vmem:[%s1007_s16 + $0xb8] sm:$0xff] %v432_v11  ;;  %v687_v13 = vpop.f32.mrb[21].mxu1 }
 0x118   : > { %v372_v14 = vpop.f32.mrb[22].mxu0  ;;  %v437_v15 = vpop.f32.mrb[22].mxu1 }
 0x119   : > { %452 = vst [vmem:[%s1007_s16 + $0x58] sm:$0xff] %v372_v14  ;;  %v651_v16 = vpop.f32.mrb[23].mxu0  ;;  %465 = vst [vmem:[%s1007_s16 + $0xc0] sm:$0xff] %v437_v15  ;;  %v690_v17 = vpop.f32.mrb[23].mxu1 }
 0x11c   : > { %v377_v18 = vpop.f32.mrb[24].mxu0 }
 0x11d   : > { %453 = vst [vmem:[%s1007_s16 + $0x60] sm:$0xff] %v377_v18  ;;  %v654_v19 = vpop.f32.mrb[25].mxu0 }
 0x11e   : > { %761 = shalt.err (!%p758_p3)
}
 0x11f   : > { %s762_s29 = scalar_lea.hbm %s1038_s24, 3200  ;;  %s766_s4 = scalar_lea.hbm %s1088_s2, 6400 }
 0x120   : > { %p763_p4 = scmp.ne.s32.totalorder %s1038_s24, %s762_s29  ;;  %p767_p9 = scmp.lt.u32.totalorder %s1038_s24, %s1088_s2 }
 0x121   : > { %p768_p10 = scmp.lt.u32.totalorder %s766_s4, %s762_s29  ;;  %p770_p12 = scmp.lt.u32.totalorder %s762_s29, %s1038_s24 }
 0x122   : > { %p764_p7 = pnand %p763_p4, %p871_p5 }
 0x123   : > { %p769_p11 = por %p768_p10, %p767_p9 }
 0x124   : > { %p765_p8 = pneg %p764_p7 }
 0x125   : > { %p771_p13 = por %p770_p12, %p769_p11 }
 0x127   : > { %p772_p0 = pnand %p771_p13, %p765_p8 }
 0x129   : > { %775 = shalt.err (!%p772_p0)
}
 0x12a   : > { %s816_s7 = smov 128   ;;  %s817_s8 = smov 8  }
 0x12b   : > { %704 = dma.vmem_to_hbm [thread:$0]  (%p871_p5), %s1040_s21, 3200, %s1038_s24, %s1045_s13, %s816_s7, %s816_s7, %s817_s8  }
 0x12c PF: > { %p710_p1 = scmp.ge.s32.totalorder %s810_s12, 2  ;;  %s495_s14 = sand.u32 1, %s798_s9  }
 0x12d   : > { %s496_s16 = scalar_lea.sflag [#allocation3], %s495_s14 }
 0x12e   : > { %p707_p2 = pnand %p710_p1, %p875_p6 }
 0x130   : > { %793 = dma.done.wait (!%p707_p2), %s496_s16, 3200  }
 0x131   : > { %795 = vsyncadd (!%p707_p2), %s496_s16, 4294964096  ;;  %p12_p3 = scmp.ge.s32.totalorder %s858_s15, 4   ;;  %s1091_s9 = smov %s802_s10 }
 0x132   : > { %s1092_s10 = smov %s806_s11  ;;  %s1093_s11 = smov %s869_s18 }
 0x133   : > { %s1094_s12 = smov %s858_s15  ;;  %14 = sbr.rel (!%p12_p3) target bundleno = 3 (0x3), region = 63 }
 0x13a   :  { %501 = vsyncpa [#allocation3], 1 }
 0x13b   :  { %503 = vsyncpa [#allocation3 + $0x1], 1 }

</bundles_post_ra>
